<compile_context>
chip_gen: v5e
topology: v5e:2x2
jax: 0.10.0
libtpu: 0.0.40
codegen_flags: <defaults>
</compile_context>

<pallas_src>
import jax
import jax.numpy as jnp
from jax.experimental import pallas as pl
from jax.experimental.pallas import tpu as pltpu


def _round_up(x, m):
    return ((x + m - 1) // m) * m


def _vmem_budget_bytes():
    """Generation-aware (per-step budget, physical capacity) in bytes."""
    try:
        cap = int(pltpu.get_tpu_info().vmem_capacity_bytes)
    except Exception:  # non-TPU / interpret fallback
        cap = 64 * 2**20
    # ~45% of physical VMEM per pipeline step leaves headroom for internal
    # scratch: ~28 MiB on v7x (64 MiB/TC), ~57 MiB on v5e/v6e (128 MiB).
    return int(cap * 0.45), cap


# ---------------------------------------------------------------------------
# Kernels
# ---------------------------------------------------------------------------
def _conv_gemm_fullk_kernel(w_ref, x_ref, b_ref, o_ref):
    # w_ref: [O, K] (resident, invariant index), x_ref: [K, tn] (batch squeezed),
    # b_ref: [O, 1] f32, o_ref: [O, tn] f32. One MXU matmul per (b, n) step.
    o_ref[...] = (jnp.dot(w_ref[...], x_ref[...],
                          preferred_element_type=jnp.float32) + b_ref[...])


def _conv_gemm_ksplit_kernel(w_ref, x_ref, b_ref, o_ref):
    # w_ref: [O, tk], x_ref: [tk, tn], b_ref: [O, 1] f32, o_ref: [O, tn] f32.
    # o_ref's block index is invariant along k -> it stays resident in VMEM and
    # doubles as the accumulator (bias-initialized at k == 0).
    k = pl.program_id(2)

    @pl.when(k == 0)
    def _init():
        o_ref[...] = jnp.broadcast_to(b_ref[...], o_ref.shape)

    o_ref[...] += jnp.dot(w_ref[...], x_ref[...],
                          preferred_element_type=jnp.float32)


# ---------------------------------------------------------------------------
# VMEM estimates (include double buffering; sublane/lane padding accounted)
# ---------------------------------------------------------------------------
def _fullk_vmem_bytes(O, K, tn, esize):
    Of = _round_up(O, 8)
    Ow = _round_up(O, 32 // esize)
    Ks = _round_up(K, 32 // esize)
    return (2 * Ow * _round_up(K, 128) * esize   # resident weight (counted 2x, conservative)
            + 2 * Ks * tn * esize                # cols tiles (double-buffered)
            + 2 * Of * tn * 4                    # output tiles f32 (double-buffered)
            + 2 * Of * 128 * 4)                  # bias


def _ksplit_vmem_bytes(O, tk, tn, esize):
    Of = _round_up(O, 8)
    Ow = _round_up(O, 32 // esize)
    return (2 * Ow * tk * esize + 2 * tk * tn * esize
            + 2 * Of * tn * 4 + 2 * Of * 128 * 4)


# ---------------------------------------------------------------------------
# GEMM dispatch:  out[b] = W @ cols[b] + bias   ->  [B, O, L] f32
# ---------------------------------------------------------------------------
def _pallas_conv_gemm(w, bias_col, cols, O, K, L):
    """w: [O, K], bias_col: [O, 1] f32, cols: [B, K, L] -> [B, O, L] f32."""
    B = cols.shape[0]
    esize = cols.dtype.itemsize
    budget, cap = _vmem_budget_bytes()

    def _limit(est):
        return int(min(max(1.5 * est, 16 * 2**20), 0.75 * cap))

    # ---- full-K fast path: resident weight, one matmul per (b, n) step -------
    tn = min(2048, _round_up(L, 128))
    while tn > 128 and _fullk_vmem_bytes(O, K, tn, esize) > budget:
        tn //= 2

    if _fullk_vmem_bytes(O, K, tn, esize) <= budget:
        grid_n = pl.cdiv(L, tn)
        est = _fullk_vmem_bytes(O, K, tn, esize)
        cost = pl.CostEstimate(
            flops=2 * O * K * B * L, transcendentals=0,
            bytes_accessed=O * K * esize + B * K * L * esize + B * O * L * 4 + O * 4)
        return pl.pallas_call(
            _conv_gemm_fullk_kernel,
            out_shape=jax.ShapeDtypeStruct((B, O, L), jnp.float32),
            grid_spec=pltpu.PrefetchScalarGridSpec(
                num_scalar_prefetch=0,
                grid=(B, grid_n),
                in_specs=[
                    pl.BlockSpec((O, K), lambda b, n: (0, 0)),          # resident weight
                    pl.BlockSpec((None, K, tn), lambda b, n: (b, 0, n)),  # cols tile
                    pl.BlockSpec((O, 1), lambda b, n: (0, 0)),          # bias (invariant)
                ],
                out_specs=pl.BlockSpec((None, O, tn), lambda b, n: (b, 0, n)),
            ),
            compiler_params=pltpu.CompilerParams(
                dimension_semantics=("parallel", "parallel"),
                vmem_limit_bytes=_limit(est)),
            cost_estimate=cost,
        )(w, cols, bias_col)

    # ---- K-split fallback (very large K only): stream K tiles ----------------
    # TODO(synk): when the full weight fits VMEM, keep it resident across the k
    # axis (full-K BlockSpec + in-kernel pl.ds slice) instead of re-streaming.
    tk = 512
    tn = min(2048, _round_up(L, 128))
    while tn > 128 and _ksplit_vmem_bytes(O, tk, tn, esize) > budget:
        tn //= 2
    while tk > 128 and _ksplit_vmem_bytes(O, tk, tn, esize) > budget:
        tk //= 2
    Kp = _round_up(K, tk)
    if Kp > K:
        w = jnp.pad(w, ((0, 0), (0, Kp - K)))
        cols = jnp.pad(cols, ((0, 0), (0, Kp - K), (0, 0)))
    grid_n = pl.cdiv(L, tn)
    grid_k = Kp // tk
    est = _ksplit_vmem_bytes(O, tk, tn, esize)
    cost = pl.CostEstimate(
        flops=2 * O * Kp * B * L, transcendentals=0,
        bytes_accessed=(B * grid_n * O * Kp * esize    # weight re-streamed per (b, n)
                        + B * Kp * L * esize + B * O * L * 4 + O * 4))
    return pl.pallas_call(
        _conv_gemm_ksplit_kernel,
        out_shape=jax.ShapeDtypeStruct((B, O, L), jnp.float32),
        grid_spec=pltpu.PrefetchScalarGridSpec(
            num_scalar_prefetch=0,
            grid=(B, grid_n, grid_k),
            in_specs=[
                pl.BlockSpec((O, tk), lambda b, n, k: (0, k)),
                pl.BlockSpec((None, tk, tn), lambda b, n, k: (b, k, n)),
                pl.BlockSpec((O, 1), lambda b, n, k: (0, 0)),
            ],
            out_specs=pl.BlockSpec((None, O, tn), lambda b, n, k: (b, 0, n)),
        ),
        compiler_params=pltpu.CompilerParams(
            dimension_semantics=("parallel", "parallel", "arbitrary"),
            vmem_limit_bytes=_limit(est)),
        cost_estimate=cost,
    )(w, cols, bias_col)


# ---------------------------------------------------------------------------
# im2col in torch.nn.functional.unfold layout, single materialization:
#   x [B, C, H, W] -> cols [B, C*kh*kw, oh*ow]   (stack + contiguous reshape)
# ---------------------------------------------------------------------------
def _im2col_bkl(x, kernel_size, stride, padding):
    kh, kw = kernel_size
    sh, sw = stride
    ph, pw = padding
    B, C, H, W = x.shape
    oh = (H - kh + 2 * ph) // sh + 1
    ow = (W - kw + 2 * pw) // sw + 1

    xp = jnp.pad(x, ((0, 0), (0, 0), (ph, ph), (pw, pw))) if (ph or pw) else x
    slabs = []
    for ki in range(kh):
        for kj in range(kw):
            slabs.append(xp[:, :, ki:ki + sh * (oh - 1) + 1:sh,
                             kj:kj + sw * (ow - 1) + 1:sw])        # [B, C, oh, ow]
    cols = jnp.stack(slabs, axis=2)                                # [B, C, kh*kw, oh, ow]
    cols = cols.reshape(B, C * kh * kw, oh * ow)                   # contiguous reshape
    return cols, oh, ow


class SparseConv2dPallas:
    """Deterministically-initialized JAX/Pallas equivalent of
    net/SparseLayer.py::SparseConv2d."""

    def __init__(self, in_channels, out_channels, kernel_size, stride=1,
                 padding=0, bias=True, key=None, compute_dtype=jnp.bfloat16):
        self.in_channels = in_channels
        self.out_channels = out_channels
        self.kernel_size = (kernel_size if isinstance(kernel_size, tuple)
                            else (kernel_size, kernel_size))
        self.stride = stride if isinstance(stride, tuple) else (stride, stride)
        self.padding = padding if isinstance(padding, tuple) else (padding, padding)
        # bf16 operands / f32 MXU accumulation by default; pass jnp.float32 for
        # bit-closer-to-PyTorch numerics.
        self.compute_dtype = compute_dtype

        kh, kw = self.kernel_size
        K = in_channels * kh * kw
        self.K = K
        # Only pad K to a lane multiple when needed; zeros are inert.
        self.K_gemm = K if K % 128 == 0 else _round_up(K, 128)

        key = jax.random.PRNGKey(0) if key is None else key
        kw_key, kb_key, mask_key = jax.random.split(key, 3)

        dense = jax.random.normal(kw_key, (out_channels, K), dtype=jnp.float32) * 0.1
        # The torch module stores a semantically-dense [O, K] matrix in sparse
        # format; mimic "sparsity" by zeroing ~50% (sparse@dense == dense@dense).
        mask = jax.random.uniform(mask_key, (out_channels, K)) > 0.5
        self.weight = dense * mask.astype(jnp.float32)             # [O, K] f32

        self.has_bias = bool(bias)
        if self.has_bias:
            self.bias = jax.random.normal(kb_key, (out_channels,), jnp.float32) * 0.1
        else:
            # Zero bias kept as a (tiny) inert operand; numerically identical
            # to the torch module's skipped add.
            self.bias = jnp.zeros((out_channels,), jnp.float32)

        w = jnp.zeros((out_channels, self.K_gemm), jnp.float32)
        w = w.at[:, :K].set(self.weight)
        self.w_gemm = w.astype(self.compute_dtype)                 # [O, K_gemm]
        self.bias_col = self.bias.reshape(out_channels, 1).astype(jnp.float32)

    def __call__(self, x):
        # x: [B, Cin, H, W] (NCHW, like PyTorch)
        B, C, H, W = x.shape
        # TODO(synk): fuse the im2col into the Pallas kernel (implicit-GEMM conv
        # reading x straight from HBM) to remove this one cols materialization.
        cols, oh, ow = _im2col_bkl(x.astype(self.compute_dtype),
                                   self.kernel_size, self.stride, self.padding)
        if self.K_gemm > self.K:
            # One extra copy only for lane-unaligned K (zeros are inert).
            cols = jnp.pad(cols, ((0, 0), (0, self.K_gemm - self.K), (0, 0)))
        out = _pallas_conv_gemm(self.w_gemm, self.bias_col, cols,
                                self.out_channels, self.K_gemm, oh * ow)  # [B, O, L]
        # Kernel already emits [B, O, L]; the NCHW reshape is free (no transpose).
        return out.reshape(B, self.out_channels, oh, ow)


def _reference(weight, bias, x, kernel_size, stride, padding):
    """Pure-JAX dense-conv reference with the same bf16-operand / f32-acc numerics."""
    O = weight.shape[0]
    C = x.shape[1]
    kh, kw = kernel_size
    w4 = weight.astype(jnp.bfloat16).reshape(O, C, kh, kw)
    out = jax.lax.conv_general_dilated(
        x.astype(jnp.bfloat16), w4, window_strides=stride,
        padding=[(padding[0], padding[0]), (padding[1], padding[1])],
        dimension_numbers=("NCHW", "OIHW", "NCHW"),
        preferred_element_type=jnp.float32)
    return out + bias.reshape(1, O, 1, 1)


if __name__ == "__main__":
    B, Cin, H, W = 2, 4, 16, 16
    Cout, ksize, stride, padding = 8, 3, 1, 1

    key = jax.random.PRNGKey(0)
    xkey, mkey = jax.random.split(key)
    x = jax.random.normal(xkey, (B, Cin, H, W), dtype=jnp.float32)

    layer = SparseConv2dPallas(Cin, Cout, ksize, stride=stride,
                               padding=padding, bias=True, key=mkey)

    fwd = jax.jit(layer.__call__)
    out = jax.block_until_ready(fwd(x))

    ref = jax.block_until_ready(
        _reference(layer.weight, layer.bias, x,
                   layer.kernel_size, layer.stride, layer.padding))

    assert out.shape == (B, Cout, H, W), out.shape
    max_err = float(jnp.max(jnp.abs(out - ref)))
    assert jnp.allclose(out, ref, atol=1e-2, rtol=1e-2), max_err

    print("KERNEL_OK")
</pallas_src>

<mosaic_0001>
module attributes {stable_mosaic.version = 11 : i64} {
  func.func @_conv_gemm_fullk_kernel(%arg0: i32, %arg1: i32, %arg2: memref<8x128xbf16, #tpu.memory_space<vmem>>, %arg3: memref<1x128x256xbf16, #tpu.memory_space<vmem>>, %arg4: memref<8x1xf32, #tpu.memory_space<vmem>>, %arg5: memref<1x8x256xf32, #tpu.memory_space<vmem>>) attributes {dimension_semantics = [#tpu.dimension_semantics<parallel>, #tpu.dimension_semantics<parallel>], iteration_bounds = array<i64: 2, 1>, scalar_prefetch = 0 : i64, scratch_operands = 0 : i64, tpu.core_type = #tpu.core_type<tc>, window_params = [{pipeline_mode = #tpu.pipeline_mode<synchronous>, transform_indices = @transform_0, window_bounds = array<i64: 8, 128>}, {transform_indices = @transform_1, window_bounds = array<i64: 1, 128, 256>}, {pipeline_mode = #tpu.pipeline_mode<synchronous>, transform_indices = @transform_2, window_bounds = array<i64: 8, 1>}, {transform_indices = @transform_3, window_bounds = array<i64: 1, 8, 256>}]} {
    %c0 = arith.constant 0 : index
    %c0_0 = arith.constant 0 : index
    %0 = vector.load %arg2[%c0, %c0_0] : memref<8x128xbf16, #tpu.memory_space<vmem>>, vector<8x128xbf16>
    %c0_1 = arith.constant 0 : index
    %c0_2 = arith.constant 0 : index
    %c0_3 = arith.constant 0 : index
    %1 = vector.load %arg3[%c0_1, %c0_2, %c0_3] : memref<1x128x256xbf16, #tpu.memory_space<vmem>>, vector<1x128x256xbf16>
    %2 = vector.shape_cast %1 : vector<1x128x256xbf16> to vector<128x256xbf16>
    %cst = arith.constant dense<0.000000e+00> : vector<8x256xf32>
    %3 = tpu.matmul %0, %2, %cst {dimension_numbers = #tpu.dot_dimension_numbers<[1], [0], [0], [1], [0, 0, 1, 1], [], []>} : vector<8x128xbf16>, vector<128x256xbf16>, vector<8x256xf32> -> vector<8x256xf32>
    %c0_4 = arith.constant 0 : index
    %c0_5 = arith.constant 0 : index
    %4 = vector.load %arg4[%c0_4, %c0_5] : memref<8x1xf32, #tpu.memory_space<vmem>>, vector<8x1xf32>
    %5 = vector.broadcast %4 : vector<8x1xf32> to vector<8x256xf32>
    %6 = arith.addf %3, %5 : vector<8x256xf32>
    %c0_6 = arith.constant 0 : index
    %c0_7 = arith.constant 0 : index
    %c0_8 = arith.constant 0 : index
    %7 = vector.load %arg5[%c0_6, %c0_7, %c0_8] : memref<1x8x256xf32, #tpu.memory_space<vmem>>, vector<1x8x256xf32>
    %8 = vector.shape_cast %7 : vector<1x8x256xf32> to vector<8x256xf32>
    %9 = vector.shape_cast %6 : vector<8x256xf32> to vector<1x8x256xf32>
    tpu.vector_store %arg5[%c0_6, %c0_7, %c0_8], %9 {strides = array<i32>} : memref<1x8x256xf32, #tpu.memory_space<vmem>>, vector<1x8x256xf32>,
    return
  }
  func.func @transform_0(%arg0: i32, %arg1: i32) -> (i32, i32) {
    %c0_i32 = arith.constant 0 : i32
    %c0_i32_0 = arith.constant 0 : i32
    %c0_i32_1 = arith.constant 0 : i32
    return %c0_i32, %c0_i32_0 : i32, i32
  }
  func.func @transform_1(%arg0: i32, %arg1: i32) -> (i32, i32, i32) {
    %c0_i32 = arith.constant 0 : i32
    %c0_i32_0 = arith.constant 0 : i32
    return %arg0, %c0_i32, %arg1 : i32, i32, i32
  }
  func.func @transform_2(%arg0: i32, %arg1: i32) -> (i32, i32) {
    %c0_i32 = arith.constant 0 : i32
    %c0_i32_0 = arith.constant 0 : i32
    %c0_i32_1 = arith.constant 0 : i32
    return %c0_i32, %c0_i32_0 : i32, i32
  }
  func.func @transform_3(%arg0: i32, %arg1: i32) -> (i32, i32, i32) {
    %c0_i32 = arith.constant 0 : i32
    %c0_i32_0 = arith.constant 0 : i32
    return %arg0, %c0_i32, %arg1 : i32, i32, i32
  }
}

</mosaic_0001>

<bundles_post_ra>
// kernel: a_call__.1
= control target key start
LH: loop header
LB: loop body
LE: loop exit
PB: predicated region body
PF: predicated region fallthrough
CT: control target
= control target key end

     0   :  { %s592_s12 = smov 0   ;;  %s594_s13 = smov 0   ;;  %s669_s0 = inlined_call_operand.vmem [shape: bf16[8,128], index: 0, kind: input, shape index: {}]   ;;  %s670_s1 = inlined_call_operand.vmem [shape: bf16[2,128,256], index: 1, kind: input, shape index: {}]   ;;  %s671_s2 = inlined_call_operand.vmem [shape: f32[8,1], index: 2, kind: input, shape index: {}]   ;;  %s672_s3 = inlined_call_operand.vmem [shape: f32[2,8,256], index: 3, kind: output, shape index: {}]  }
   0x1   :  { %s596_s14 = smov 0  }
   0x2 LB: > { %s25_s15 = sadd.s32 1, %s565_s13  ;;  %p432_p0 = scmp.ge.s32.totalorder %s569_s14, 1  ;;  %s569_s14 = sphi %s596_s14, %s13_s14   ;;  %s565_s13 = sphi %s594_s13, %s674_s13   ;;  %s561_s12 = sphi %s592_s12, %s673_s12  }
   0x3   : > { %p27_p1 = scmp.ge.s32.totalorder %s25_s15, 2  ;;  %p158_p2 = scmp.lt.s32.totalorder %s569_s14, 3 }
   0x5   : > { %s676_s15 = smov (%p27_p1, %s25_s15), 0  ;;  %p159_p3 = pnand %p432_p0, %p158_p2 }
   0x6   : > { %p191_p4 = scmp.lt.s32.totalorder (!%p159_p3), %s561_s12, 1 }
   0x7   : > { %162 = sbr.rel (%p159_p3) target bundleno = 184 (0xb8), region = 32 }
   0xc   : > { %s678_s12 = smov (!%p191_p4, %s561_s12), 1  ;;  %v227_v23 = vld [vmem:[%s671_s2] sm:$0xff]  ;;  %v571_v27 = vmov 0  }
   0xd   : > { %s503_s16 = sshll.u32 %s678_s12, 7  ;;  %546 = vset.pattern.permute.xlu0 %v571_v27  ;;  %v210_v50 = vld [vmem:[%s669_s0] sm:$0xf]  ;;  %s504_s24 = sshll.u32 %s678_s12, 4 }
   0xe   : > { %s616_s19 = scalar_lea.vmem %s670_s1, %s503_s16  ;;  %230 = vperm.xlu0 %546, %v227_v23   ;;  %s208_s27 = scalar_lea.vmem %s672_s3, %s504_s24 }
   0xf   : > { %v495_v0 = vld [vmem:[%s616_s19 + $0x70] sm:$0xf]  ;;  %v520_v1 = vld [vmem:[%s616_s19 + $0x74] sm:$0xf0]  ;;  %v519_v2 = vld [vmem:[%s616_s19 + $0x74] sm:$0xf] }
  0x10   : > { %v496_v3 = vor.u32 %v520_v1, %v495_v0  ;;  %v497_v4 = vld [vmem:[%s616_s19 + $0x78] sm:$0xf0]  ;;  %v487_v5 = vld [vmem:[%s616_s19 + $0x60] sm:$0xf]  ;;  %v518_v6 = vld [vmem:[%s616_s19 + $0x64] sm:$0xf0] }
  0x11   : > { %v500_v7 = vor.u32 %v519_v2, %v497_v4  ;;  %v517_v8 = vld [vmem:[%s616_s19 + $0x64] sm:$0xf]  ;;  %v489_v9 = vld [vmem:[%s616_s19 + $0x68] sm:$0xf0]  ;;  %v488_v10 = vor.u32 %v518_v6, %v487_v5  ;;  %v479_v12 = vld [vmem:[%s616_s19 + $0x50] sm:$0xf] }
  0x12   : > { %313 = vmatpush.bf16.msra.mxu0 %v496_v3  ;;  %v492_v11 = vor.u32 %v517_v8, %v489_v9  ;;  %v516_v13 = vld [vmem:[%s616_s19 + $0x54] sm:$0xf0]  ;;  %v515_v14 = vld [vmem:[%s616_s19 + $0x54] sm:$0xf]  ;;  %v481_v15 = vld [vmem:[%s616_s19 + $0x58] sm:$0xf0] }
  0x13   : > { %326 = vmatpush.bf16.msra.mxu1 %v500_v7  ;;  %v480_v16 = vor.u32 %v516_v13, %v479_v12  ;;  %v484_v17 = vor.u32 %v515_v14, %v481_v15  ;;  %v471_v18 = vld [vmem:[%s616_s19 + $0x40] sm:$0xf]  ;;  %v514_v19 = vld [vmem:[%s616_s19 + $0x44] sm:$0xf0]  ;;  %v513_v20 = vld [vmem:[%s616_s19 + $0x44] sm:$0xf] }
  0x14   : > { %v473_v21 = vld [vmem:[%s616_s19 + $0x48] sm:$0xf0]  ;;  %v472_v22 = vor.u32 %v514_v19, %v471_v18  ;;  %v463_v25 = vld [vmem:[%s616_s19 + $0x30] sm:$0xf]  ;;  %v512_v26 = vld [vmem:[%s616_s19 + $0x34] sm:$0xf0] }
  0x15   : > { %v476_v24 = vor.u32 %v513_v20, %v473_v21  ;;  %v511_v28 = vld [vmem:[%s616_s19 + $0x34] sm:$0xf]  ;;  %v465_v29 = vld [vmem:[%s616_s19 + $0x38] sm:$0xf0]  ;;  %v464_v30 = vor.u32 %v512_v26, %v463_v25  ;;  %v455_v32 = vld [vmem:[%s616_s19 + $0x20] sm:$0xf] }
  0x16   : > { %314 = vmatpush.bf16.msra.mxu0 %v488_v10  ;;  %v468_v31 = vor.u32 %v511_v28, %v465_v29  ;;  %v510_v33 = vld [vmem:[%s616_s19 + $0x24] sm:$0xf0]  ;;  %v509_v34 = vld [vmem:[%s616_s19 + $0x24] sm:$0xf]  ;;  %v457_v35 = vld [vmem:[%s616_s19 + $0x28] sm:$0xf0] }
  0x17   : > { %327 = vmatpush.bf16.msra.mxu1 %v492_v11  ;;  %v456_v36 = vor.u32 %v510_v33, %v455_v32  ;;  %v460_v37 = vor.u32 %v509_v34, %v457_v35  ;;  %v447_v38 = vld [vmem:[%s616_s19 + $0x10] sm:$0xf]  ;;  %v508_v39 = vld [vmem:[%s616_s19 + $0x14] sm:$0xf0]  ;;  %v507_v40 = vld [vmem:[%s616_s19 + $0x14] sm:$0xf] }
  0x18   : > { %v449_v41 = vld [vmem:[%s616_s19 + $0x18] sm:$0xf0]  ;;  %v448_v42 = vor.u32 %v508_v39, %v447_v38  ;;  %v439_v44 = vld [vmem:[%s616_s19] sm:$0xf]  ;;  %v506_v45 = vld [vmem:[%s616_s19 + $0x4] sm:$0xf0] }
  0x19   : > { %v452_v43 = vor.u32 %v507_v40, %v449_v41  ;;  %v505_v46 = vld [vmem:[%s616_s19 + $0x4] sm:$0xf]  ;;  %v441_v47 = vld [vmem:[%s616_s19 + $0x8] sm:$0xf0]  ;;  %v440_v48 = vor.u32 %v506_v45, %v439_v44 }
  0x1a   : > { %315 = vmatpush.bf16.msra.mxu0 %v480_v16  ;;  %v444_v49 = vor.u32 %v505_v46, %v441_v47 }
  0x1b   : > { %328 = vmatpush.bf16.msra.mxu1 %v484_v17 }
  0x1e   : > { %316 = vmatpush.bf16.msra.mxu0 %v472_v22 }
  0x1f   : > { %329 = vmatpush.bf16.msra.mxu1 %v476_v24 }
  0x22   : > { %317 = vmatpush.bf16.msra.mxu0 %v464_v30 }
  0x23   : > { %330 = vmatpush.bf16.msra.mxu1 %v468_v31 }
  0x26   : > { %318 = vmatpush.bf16.msra.mxu0 %v456_v36 }
  0x27   : > { %331 = vmatpush.bf16.msra.mxu1 %v460_v37 }
  0x2a   : > { %319 = vmatpush.bf16.msra.mxu0 %v448_v42 }
  0x2b   : > { %332 = vmatpush.bf16.msra.mxu1 %v452_v43 }
  0x2e   : > { %320 = vmatpush.bf16.msra.mxu0 %v440_v48 }
  0x2f   : > { %333 = vmatpush.bf16.msra.mxu1 %v444_v49 }
  0x31   : > { %321 = vmatmul.bf16.vlgmr.msra.gmra.mxu0 %v210_v50 }
  0x32   : > { %334 = vmatmul.bf16.vlgmr.msra.gmra.mxu1 %v210_v50 }
  0x80   : > { %v231_v51 = vpop.permute.xlu0 %230 }
  0xae   : > { %v322_v52 = vpop.f32.mrf.mxu0 }
  0xaf   : > { %v323_v53 = vadd.f32 %v322_v52, %v231_v51  ;;  %v335_v54 = vpop.f32.mrf.mxu1 }
  0xb0   : > { %v336_v55 = vadd.f32 %v335_v54, %v231_v51 }
  0xb1   : > { %339 = vst [vmem:[%s208_s27] sm:$0xff] %v323_v53 }
  0xb2   : > { %340 = vst [vmem:[%s208_s27 + $0x8] sm:$0xff] %v336_v55 }
  0xb6   : > { %v324_v56 = vpop.f32.mrf.mxu0 }
  0xb7   : > { %v337_v57 = vpop.f32.mrf.mxu1 }
  0xb8 PF: > { %s13_s14 = sadd.s32 1, %s569_s14   ;;  %s673_s12 = smov %s565_s13 }
  0xb9   : > { %p10_p5 = scmp.ge.s32.totalorder %s13_s14, 4   ;;  %s674_s13 = smov %s676_s15 }
  0xbb   :  { %12 = sbr.rel (!%p10_p5) target bundleno = 2 (0x2), region = 62 }

</bundles_post_ra>
